<compile_context>
chip_gen: v7x
topology: tpu7x:2x2x1
jax: 0.10.0
libtpu: 0.0.40
codegen_flags: <defaults>
</compile_context>

<pallas_src>
import jax
import jax.numpy as jnp
from jax import lax
from jax.experimental import pallas as pl
from jax.experimental.pallas import tpu as pltpu


def _mlp_kernel(h_ref, w1_ref, b1_ref, w2_ref, b2_ref, y_ref):
    # h_ref : (tm, H)     current row tile
    # w1_ref: (E, H)      PyTorch layout (out, in) — NT matmul, no transpose
    # b1_ref: (1, E)
    # w2_ref: (Y, E)
    # b2_ref: (1, Y)
    # y_ref : (tm, Y)
    x = h_ref[...]

    # z = x @ W1^T  (contract last dim of both -> MXU-native NT matmul)
    z = lax.dot_general(
        x, w1_ref[...],
        dimension_numbers=(((1,), (1,)), ((), ())),
        preferred_element_type=jnp.float32,
    )
    z = jnp.maximum(z + b1_ref[...].astype(jnp.float32), 0.0)

    # cast hidden activation to the weight dtype so bf16 weights hit the fast
    # MXU path; accumulation of the second matmul stays f32.
    zc = z.astype(w2_ref.dtype)

    y = lax.dot_general(
        zc, w2_ref[...],
        dimension_numbers=(((1,), (1,)), ((), ())),
        preferred_element_type=jnp.float32,
    ) + b2_ref[...].astype(jnp.float32)

    y_ref[...] = y.astype(y_ref.dtype)


def mlp_plain_forward(h, w1, b1, w2, b2, *, row_tile=256):
    """Pallas TPU implementation of MLP_plain.forward.

    h : (..., H)   input, arbitrary leading dims (flattened to rows)
    w1: (E, H)     first Linear weight (PyTorch layout)
    b1: (E,)
    w2: (Y, E)     second Linear weight (PyTorch layout)
    b2: (Y,)
    returns (..., Y)
    """
    *lead, H = h.shape
    E = w1.shape[0]
    Y = w2.shape[0]

    h2 = h.reshape(-1, H)
    M = h2.shape[0]

    # Row tiling: single full block for small M (no pipeline overhead for the
    # toy regime), otherwise 256-row tiles (8-sublane aligned, VMEM-safe).
    if M <= row_tile:
        tm = M
        m_pad = M
    else:
        tm = row_tile
        m_pad = ((M + tm - 1) // tm) * tm
        if m_pad != M:
            h2 = jnp.pad(h2, ((0, m_pad - M), (0, 0)))

    b1_2d = b1.reshape(1, E)
    b2_2d = b2.reshape(1, Y)

    grid = (m_pad // tm,)

    out = pl.pallas_call(
        _mlp_kernel,
        out_shape=jax.ShapeDtypeStruct((m_pad, Y), h.dtype),
        grid_spec=pltpu.PrefetchScalarGridSpec(
            num_scalar_prefetch=0,
            grid=grid,
            in_specs=[
                pl.BlockSpec((tm, H), lambda i: (i, 0)),   # row tile of h
                pl.BlockSpec((E, H), lambda i: (0, 0)),    # W1 resident
                pl.BlockSpec((1, E), lambda i: (0, 0)),    # b1 resident
                pl.BlockSpec((Y, E), lambda i: (0, 0)),    # W2 resident
                pl.BlockSpec((1, Y), lambda i: (0, 0)),    # b2 resident
            ],
            out_specs=pl.BlockSpec((tm, Y), lambda i: (i, 0)),
        ),
        compiler_params=pltpu.CompilerParams(
            dimension_semantics=("parallel",),
        ),
    )(h2, w1, b1_2d, w2, b2_2d)

    if m_pad != M:
        out = out[:M]
    return out.reshape(*lead, Y)


if __name__ == "__main__":
    key = jax.random.PRNGKey(0)
    B, S, H, E, Y = 2, 8, 32, 64, 16  # batch, seq, h_size, embedding_size, y_size
    k0, k1, k2, k3, k4 = jax.random.split(key, 5)

    h = jax.random.normal(k0, (B, S, H), dtype=jnp.float32)

    # xavier_uniform with relu gain (matches the PyTorch init semantics)
    gain = 2.0 ** 0.5
    lim1 = gain * (6.0 / (H + E)) ** 0.5
    lim2 = gain * (6.0 / (E + Y)) ** 0.5
    w1 = jax.random.uniform(k1, (E, H), minval=-lim1, maxval=lim1, dtype=jnp.float32)
    w2 = jax.random.uniform(k2, (Y, E), minval=-lim2, maxval=lim2, dtype=jnp.float32)
    b1 = jax.random.uniform(k3, (E,), minval=-1.0 / H ** 0.5, maxval=1.0 / H ** 0.5,
                            dtype=jnp.float32)
    b2 = jax.random.uniform(k4, (Y,), minval=-1.0 / E ** 0.5, maxval=1.0 / E ** 0.5,
                            dtype=jnp.float32)

    y = mlp_plain_forward(h, w1, b1, w2, b2)
    y = jax.block_until_ready(y)

    # reference: plain JAX, identical semantics to the PyTorch module
    z_ref = jnp.maximum(jnp.einsum("bsh,eh->bse", h, w1) + b1, 0.0)
    y_ref = jnp.einsum("bse,ye->bsy", z_ref, w2) + b2

    assert y.shape == (B, S, Y)
    assert jnp.allclose(y, y_ref, atol=1e-5, rtol=1e-5)

    print("KERNEL_OK")
</pallas_src>

<mosaic_0001>
module attributes {stable_mosaic.version = 11 : i64} {
  func.func @_mlp_kernel(%arg0: i32, %arg1: memref<16x32xf32, #tpu.memory_space<vmem>>, %arg2: memref<64x32xf32, #tpu.memory_space<vmem>>, %arg3: memref<1x64xf32, #tpu.memory_space<vmem>>, %arg4: memref<16x64xf32, #tpu.memory_space<vmem>>, %arg5: memref<1x16xf32, #tpu.memory_space<vmem>>, %arg6: memref<16x16xf32, #tpu.memory_space<vmem>>) attributes {dimension_semantics = [#tpu.dimension_semantics<parallel>], iteration_bounds = array<i64: 1>, scalar_prefetch = 0 : i64, scratch_operands = 0 : i64, tpu.core_type = #tpu.core_type<tc>, window_params = [{transform_indices = @transform_0, window_bounds = array<i64: 16, 32>}, {pipeline_mode = #tpu.pipeline_mode<synchronous>, transform_indices = @transform_1, window_bounds = array<i64: 64, 32>}, {pipeline_mode = #tpu.pipeline_mode<synchronous>, transform_indices = @transform_2, window_bounds = array<i64: 1, 64>}, {pipeline_mode = #tpu.pipeline_mode<synchronous>, transform_indices = @transform_3, window_bounds = array<i64: 16, 64>}, {pipeline_mode = #tpu.pipeline_mode<synchronous>, transform_indices = @transform_4, window_bounds = array<i64: 1, 16>}, {transform_indices = @transform_5, window_bounds = array<i64: 16, 16>}]} {
    %c0 = arith.constant 0 : index
    %c0_0 = arith.constant 0 : index
    %0 = vector.load %arg1[%c0, %c0_0] : memref<16x32xf32, #tpu.memory_space<vmem>>, vector<16x32xf32>
    %c0_1 = arith.constant 0 : index
    %c0_2 = arith.constant 0 : index
    %1 = vector.load %arg2[%c0_1, %c0_2] : memref<64x32xf32, #tpu.memory_space<vmem>>, vector<64x32xf32>
    %cst = arith.constant dense<0.000000e+00> : vector<16x64xf32>
    %2 = tpu.matmul %0, %1, %cst {dimension_numbers = #tpu.dot_dimension_numbers<[1], [1], [0], [0], [0, 0, 1, 0], [], []>} : vector<16x32xf32>, vector<64x32xf32>, vector<16x64xf32> -> vector<16x64xf32>
    %c0_3 = arith.constant 0 : index
    %c0_4 = arith.constant 0 : index
    %3 = vector.load %arg3[%c0_3, %c0_4] : memref<1x64xf32, #tpu.memory_space<vmem>>, vector<1x64xf32>
    %4 = vector.broadcast %3 : vector<1x64xf32> to vector<16x64xf32>
    %5 = arith.addf %2, %4 : vector<16x64xf32>
    %cst_5 = arith.constant 0.000000e+00 : f32
    %6 = vector.broadcast %cst_5 : f32 to vector<16x64xf32>
    %7 = arith.maximumf %5, %6 : vector<16x64xf32>
    %c0_6 = arith.constant 0 : index
    %c0_7 = arith.constant 0 : index
    %8 = vector.load %arg4[%c0_6, %c0_7] : memref<16x64xf32, #tpu.memory_space<vmem>>, vector<16x64xf32>
    %cst_8 = arith.constant dense<0.000000e+00> : vector<16x16xf32>
    %9 = tpu.matmul %7, %8, %cst_8 {dimension_numbers = #tpu.dot_dimension_numbers<[1], [1], [0], [0], [0, 0, 1, 0], [], []>} : vector<16x64xf32>, vector<16x64xf32>, vector<16x16xf32> -> vector<16x16xf32>
    %c0_9 = arith.constant 0 : index
    %c0_10 = arith.constant 0 : index
    %10 = vector.load %arg5[%c0_9, %c0_10] : memref<1x16xf32, #tpu.memory_space<vmem>>, vector<1x16xf32>
    %11 = vector.broadcast %10 : vector<1x16xf32> to vector<16x16xf32>
    %12 = arith.addf %9, %11 : vector<16x16xf32>
    %c0_11 = arith.constant 0 : index
    %c0_12 = arith.constant 0 : index
    %13 = vector.load %arg6[%c0_11, %c0_12] : memref<16x16xf32, #tpu.memory_space<vmem>>, vector<16x16xf32>
    tpu.vector_store %arg6[%c0_11, %c0_12], %12 {strides = array<i32>} : memref<16x16xf32, #tpu.memory_space<vmem>>, vector<16x16xf32>,
    return
  }
  func.func @transform_0(%arg0: i32) -> (i32, i32) {
    %c0_i32 = arith.constant 0 : i32
    %c0_i32_0 = arith.constant 0 : i32
    return %arg0, %c0_i32 : i32, i32
  }
  func.func @transform_1(%arg0: i32) -> (i32, i32) {
    %c0_i32 = arith.constant 0 : i32
    %c0_i32_0 = arith.constant 0 : i32
    %c0_i32_1 = arith.constant 0 : i32
    return %c0_i32, %c0_i32_0 : i32, i32
  }
  func.func @transform_2(%arg0: i32) -> (i32, i32) {
    %c0_i32 = arith.constant 0 : i32
    %c0_i32_0 = arith.constant 0 : i32
    %c0_i32_1 = arith.constant 0 : i32
    return %c0_i32, %c0_i32_0 : i32, i32
  }
  func.func @transform_3(%arg0: i32) -> (i32, i32) {
    %c0_i32 = arith.constant 0 : i32
    %c0_i32_0 = arith.constant 0 : i32
    %c0_i32_1 = arith.constant 0 : i32
    return %c0_i32, %c0_i32_0 : i32, i32
  }
  func.func @transform_4(%arg0: i32) -> (i32, i32) {
    %c0_i32 = arith.constant 0 : i32
    %c0_i32_0 = arith.constant 0 : i32
    %c0_i32_1 = arith.constant 0 : i32
    return %c0_i32, %c0_i32_0 : i32, i32
  }
  func.func @transform_5(%arg0: i32) -> (i32, i32) {
    %c0_i32 = arith.constant 0 : i32
    %c0_i32_0 = arith.constant 0 : i32
    return %arg0, %c0_i32 : i32, i32
  }
}

</mosaic_0001>

<bundles_post_ra>
// kernel: tpu_custom_call.1
= control target key start
LH: loop header
LB: loop body
LE: loop exit
PB: predicated region body
PF: predicated region fallthrough
CT: control target
= control target key end

     0   :  { %vm38_vm0 = vcmask 261120   ;;  %vm155_vm2 = vcmask 523264   ;;  %s490_s0 = inlined_call_operand.vmem [shape: f32[16,32], index: 0, kind: input, shape index: {}]   ;;  %s491_s1 = inlined_call_operand.vmem [shape: f32[64,32], index: 1, kind: input, shape index: {}]   ;;  %s492_s2 = inlined_call_operand.vmem [shape: f32[1,64], index: 2, kind: input, shape index: {}]   ;;  %s493_s3 = inlined_call_operand.vmem [shape: f32[16,64], index: 3, kind: input, shape index: {}]   ;;  %s494_s4 = inlined_call_operand.vmem [shape: f32[1,16], index: 4, kind: input, shape index: {}]   ;;  %s495_s5 = inlined_call_operand.hbm [shape: f32[16,16], index: 5, kind: output, shape index: {}]  }
   0x1   :  { %v23_v0 = vld [vmem:[%s491_s1] sm:$0xff]  ;;  %v24_v1 = vld [vmem:[%s491_s1 + $0x8] sm:$0xff]  ;;  %v25_v2 = vld [vmem:[%s491_s1 + $0x10] sm:$0xff] }
   0x2   :  { %v318_v3 = vpack.c.bf16 %v24_v1, %v23_v0  ;;  %vm419_vm1 = vmpackc.low %vm38_vm0, %vm38_vm0  ;;  %v26_v5 = vld [vmem:[%s491_s1 + $0x18] sm:$0xff]  ;;  %v21_v7 = vld [vmem:[%s490_s0] sm:$0xff] }
   0x3   :  { %v324_v6 = vpack.c.bf16 %v26_v5, %v25_v2  ;;  %v146_v8 = vld [vmem:[%s493_s3] sm:$0xff]  ;;  %308 = vmatprep.mubr.msk.f32.mxu0 %vm38_vm0, %v21_v7  ;;  %v147_v9 = vld [vmem:[%s493_s3 + $0x8] sm:$0xff]  ;;  %vm343_vm3 = vmpackc.low %vm155_vm2, %vm155_vm2 }
   0x4   :  { %320 = vmatprep.subr.msk.bf16.mxu0 %vm419_vm1, %v318_v3  ;;  %v342_v10 = vpack.c.bf16 %v147_v9, %v146_v8 }
   0x5   :  { %323 = vmatpush3.bf16.xpose.msk.msra.mxu0 %vm419_vm1, %v318_v3 }
   0x6   :  { %326 = vmatprep.subr.msk.bf16.mxu0 %vm419_vm1, %v324_v6 }
   0x7   :  { %10 = vsyncpa [#allocation3], 0  ;;  %v27_v11 = vld [vmem:[%s491_s1 + $0x20] sm:$0xff]  ;;  %v28_v12 = vld [vmem:[%s491_s1 + $0x28] sm:$0xff]  ;;  %344 = vmatprep.subr.msk.bf16.mxu1 %vm343_vm3, %v342_v10  ;;  %vm243_vm4 = vcmask 130048  }
   0x8   :  { %347 = vmatpush3.bf16.xpose.msk.msra.mxu1 %vm343_vm3, %v342_v10  ;;  %v330_v13 = vpack.c.bf16 %v28_v12, %v27_v11  ;;  %v29_v14 = vld [vmem:[%s491_s1 + $0x30] sm:$0xff]  ;;  %v30_v15 = vld [vmem:[%s491_s1 + $0x38] sm:$0xff]  ;;  %v22_v17 = vld [vmem:[%s490_s0 + $0x8] sm:$0xff]  ;;  %s375_s0 = smov [#allocation2]  }
   0x9   :  { %v336_v16 = vpack.c.bf16 %v30_v15, %v29_v14  ;;  %v262_v18 = vld [vmem:[%s492_s2] ss:$0 sm:$0xff]  ;;  %s251_s19 = sshll.u32 %s375_s0, 4  ;;  %s252_s19 = int_to_ptr.vmem [resolvable:$true] %s251_s19 }
   0xa   :  { %v273_v25 = vld [vmem:[%s494_s4] ss:$0 sm:$0xff]  ;;  %s351_s2 = scalar_lea.vmem %s252_s19, 256  ;;  %p356_p1 = scmp.lt.s32.totalorder %s252_s19, %s252_s19 }
   0xb   :  { %p352_p0 = scmp.ne.s32.totalorder %s252_s19, %s351_s2  ;;  %p357_p2 = scmp.lt.s32.totalorder %s351_s2, %s351_s2 }
   0xd   :  { %329 = vmatpush3.bf16.xpose.msk.msra.mxu0 %vm419_vm1, %v324_v6  ;;  %p358_p3 = por %p357_p2, %p356_p1 }
   0xe   :  { %332 = vmatprep.subr.msk.bf16.mxu0 %vm419_vm1, %v330_v13 }
   0xf   :  { %p359_p4 = pnand %p358_p3, %p352_p0 }
  0x15   :  { %335 = vmatpush3.bf16.xpose.msk.msra.mxu0 %vm419_vm1, %v330_v13 }
  0x16   :  { %338 = vmatprep.subr.msk.bf16.mxu0 %vm419_vm1, %v336_v16 }
  0x1d   :  { %341 = vmatpush3.bf16.xpose.msk.msra.mxu0 %vm419_vm1, %v336_v16 }
  0x24   :  { %309 = vmatmul.mubr.msk.f32.vlgmr.msra.gmra.mrb[0].mxu0 %vm38_vm0, %v22_v17 }
  0xf7   :  { %v310_v19 = vpop.f32.mrb[0].mxu0 }
  0xf8   :  { %v141_v20 = vadd.f32 %v310_v19, %v262_v18  ;;  %v135_v21 = vpop.f32.mrb[1].mxu0 }
  0xf9   :  { %v136_v22 = vadd.f32 %v262_v18, %v135_v21 }
  0xfa   :  { %v145_v24 = vmax.f32 %v141_v20, 0.0 }
  0xfb   :  { %v144_v23 = vmax.f32 %v136_v22, 0.0 }
  0xfd   :  { %315 = vmatprep.mubr.msk.f32.mxu1 %vm155_vm2, %v144_v23 }
  0xfe   :  { %316 = vmatmul.mubr.msk.f32.vlgmr.msra.gmra.mrb[0].mxu1 %vm155_vm2, %v145_v24 }
 0x1d1   :  { %v317_v26 = vpop.f32.mrb[0].mxu1 }
 0x1d2   :  { %v240_v27 = vadd.f32 %v317_v26, %v273_v25  ;;  %v234_v28 = vpop.f32.mrb[1].mxu1 }
 0x1d3   :  { %v235_v29 = vadd.f32 %v273_v25, %v234_v28 }
 0x1d4   :  { %245 = vst.msk [vmem:[#allocation2 + $0x8] sm:$0xff] %vm243_vm4, %v240_v27 }
 0x1d5   :  { %244 = vst.msk [vmem:[#allocation2] sm:$0xff] %vm243_vm4, %v235_v29 }
 0x1d6   :  { %362 = shalt.err (!%p359_p4)
}
 0x1d7   :  { %s363_s4 = scalar_lea.hbm %s495_s5, 256 }
 0x1d8   :  { %p364_p5 = scmp.ne.s32.totalorder %s495_s5, %s363_s4  ;;  %p367_p6 = scmp.lt.u32.totalorder %s363_s4, %s495_s5 }
 0x1da   :  { %p369_p7 = pnand %p367_p6, %p364_p5 }
 0x1dc   :  { %372 = shalt.err (!%p369_p7)
}
 0x1dd   :  { %s376_s26 = smov 128   ;;  %s377_s27 = smov 8  }
 0x1de   :  { %257 = dma.vmem_to_hbm [thread:$0]  %s252_s19, 256, %s495_s5, [#allocation3], %s376_s26, %s376_s26, %s377_s27  }
 0x1df   :  { %373 = dma.done.wait [#allocation3], 256  }
 0x1e0   :  { %374 = vsyncadd [#allocation3], 4294967040 }
 0x1e1   :  { %261 = vsyncpa [#allocation3], 1 }

</bundles_post_ra>
